<compile_context>
chip_gen: v7x
topology: tpu7x:2x2x1
jax: 0.10.0
libtpu: 0.0.40
codegen_flags: <defaults>
</compile_context>

<pallas_src>
import jax
import jax.numpy as jnp
from jax.experimental import pallas as pl
from jax.experimental.pallas import tpu as pltpu

_LANE = 128


def _cdiv(a, b):
    return -(-a // b)


def _sublane(itemsize):
    # f32 -> 8, bf16/f16 -> 16, int8/fp8 -> 32 (sub-32-bit packs along sublanes).
    return max(8, 32 // int(itemsize))


def _padded_2d_bytes(rows, cols, itemsize):
    """VMEM footprint of a (rows, cols) tile after (sublane, 128-lane) padding."""
    itemsize = int(itemsize)
    sub = _sublane(itemsize)
    return _cdiv(rows, sub) * sub * _cdiv(cols, _LANE) * _LANE * itemsize


def _tpu_vmem_and_cores():
    """(per-core VMEM capacity in bytes, #TensorCores sharing the parallel grid axis)."""
    vmem = 64 * 1024 * 1024          # safe fallback (smallest generation, v7x)
    try:
        info = pltpu.get_tpu_info()
        v = getattr(info, "vmem_capacity_bytes", None)
        if v:
            vmem = int(v)
    except Exception:
        pass
    # v7x: 64 MiB VMEM per TensorCore, 2 TCs per chip (grid axes marked
    # "parallel" are sharded across them).  v5e/v6e: 128 MiB, 1 TC.
    cores = 2 if vmem <= 64 * 1024 * 1024 else 1
    return vmem, cores


def _pick_batch_block(n, per_img_io, per_img_f32, vmem_cap, cores):
    """Images per grid step.

    Budget: double-buffered in+out blocks (4x) plus a couple of block-sized
    f32 intermediates (pooling accumulation / gate broadcast) must fit in
    ~75% of this generation's VMEM; the raw I/O block is additionally capped
    at 16 MiB (per-step overhead is already negligible there).  Then keep the
    grid long enough that every TensorCore gets >= 2 pipelined steps, and on
    2-TC chips avoid short odd grids (tail imbalance).
    """
    budget = (vmem_cap * 3) // 4
    per_img_cost = 4 * per_img_io + 2 * per_img_f32
    nb = max(1, min(n, budget // max(per_img_cost, 1)))
    nb = min(nb, max(1, (16 << 20) // max(per_img_io, 1)))

    # >= `cores` steps so both v7x TensorCores get work; >= 2*cores steps so
    # each core keeps DMA/compute overlapped -- whenever N is large enough.
    for min_steps in (cores, 2 * cores):
        if n >= min_steps and _cdiv(n, nb) < min_steps:
            nb = _cdiv(n, min_steps)

    # Short grids on 2-TC chips: prefer an even step count.
    if cores > 1:
        steps = _cdiv(n, nb)
        if 1 < steps < 8 and steps % cores != 0:
            cand_nb = max(1, _cdiv(n, steps + (cores - steps % cores)))
            if _cdiv(n, cand_nb) % cores == 0:
                nb = cand_nb
    return int(nb)


def _se_kernel(x_ref, w1t_ref, b1_ref, w2t_ref, b2_ref, o_ref):
    # x_ref block: (Nb, C, HW) with HW on the lane (fast) axis.

    # ---- Squeeze: AdaptiveAvgPool2d(1) == mean over the spatial axis --------
    # f32 accumulation (exact for f32 inputs, accurate for bf16 inputs).
    pooled = jnp.mean(x_ref[...], axis=-1, dtype=jnp.float32)            # (Nb, C)

    # ---- Excite: two 1x1 convs on a 1x1 map == two tiny matmuls -------------
    # Weights arrive pre-transposed (and pre-cast to bf16 for bf16 activations)
    # so both dots are plain (rows) @ (in, out) with f32 accumulation; they are
    # trivially small and hide under the x DMA.
    w1t = w1t_ref[...]
    h = jnp.dot(pooled.astype(w1t.dtype), w1t,
                preferred_element_type=jnp.float32) + b1_ref[...]        # (Nb, Cs)
    h = h * jax.nn.sigmoid(h)                                            # Swish
    w2t = w2t_ref[...]
    g = jnp.dot(h.astype(w2t.dtype), w2t,
                preferred_element_type=jnp.float32) + b2_ref[...]        # (Nb, C)
    g = jax.nn.sigmoid(g)                                                # gate

    # ---- Rescale -------------------------------------------------------------
    # Re-read x from the (unmodified) input block -- intentionally no f32 copy
    # of the block is kept live across the matmuls -- and broadcast the gate
    # over the lane axis.  If a bundle dump ever shows a spill loop here,
    # restructure this line as a fori_loop over sublane chunks of x_ref.
    o_ref[...] = (x_ref[...] * g[:, :, None].astype(x_ref.dtype)).astype(o_ref.dtype)


def squeeze_excitation(x, w1, b1, w2, b2, *, block_n=None, mxu_dtype=None,
                       donate_x=False):
    """SqueezeExcitation forward (Swish hidden activation, Sigmoid gate — the
    module's defaults).  x: (N, C, H, W); w1: (Cs, C); b1: (Cs,); w2: (C, Cs);
    b2: (C,)."""
    N, C, H, W = x.shape
    Cs = w1.shape[0]
    HW = H * W
    itemsize = x.dtype.itemsize

    # Lane-dense view of the contiguous NCHW tensor (free reshape).
    x3 = x.reshape(N, C, HW)

    # MXU operand dtype follows the activation dtype: bf16 activations -> bf16
    # matmul operands (single MXU pass on every generation); f32 activations
    # keep f32 operands to preserve the module's numerics (the matmuls are
    # hidden under DMA either way).
    if mxu_dtype is None:
        mxu_dtype = x.dtype if itemsize < 4 else jnp.float32

    # Pre-transpose weights so the kernel does (rows) @ (in, out); biases stay
    # f32 and are added to the f32 accumulator.
    w1t = jnp.transpose(w1).astype(mxu_dtype)            # (C, Cs)
    w2t = jnp.transpose(w2).astype(mxu_dtype)            # (Cs, C)
    b1r = b1.reshape(1, Cs).astype(jnp.float32)
    b2r = b2.reshape(1, C).astype(jnp.float32)

    vmem_cap, cores = _tpu_vmem_and_cores()
    per_img_io = _padded_2d_bytes(C, HW, itemsize)       # padded per-image block
    per_img_f32 = _padded_2d_bytes(C, HW, 4)             # f32 intermediates
    if block_n is None:
        nb = _pick_batch_block(N, per_img_io, per_img_f32, vmem_cap, cores)
    else:
        nb = max(1, min(int(block_n), N))
    steps = _cdiv(N, nb)                                  # ragged tail is safe:
                                                          # rows never mix and
                                                          # OOB writes are dropped

    # VMEM budget derived from the real padded footprint: double-buffered
    # in + out blocks, block-sized f32 intermediates, double-buffered weight
    # tiles, plus headroom — clamped to this generation's capacity.
    w_isz = jnp.dtype(mxu_dtype).itemsize
    weights_bytes = (_padded_2d_bytes(C, Cs, w_isz) + _padded_2d_bytes(Cs, C, w_isz)
                     + _padded_2d_bytes(1, Cs, 4) + _padded_2d_bytes(1, C, 4))
    need = 4 * nb * per_img_io + 2 * nb * per_img_f32 + 2 * weights_bytes
    vmem_limit = max(16 << 20, min(int(need * 1.2) + (2 << 20), int(vmem_cap * 0.9)))

    out3 = pl.pallas_call(
        _se_kernel,
        out_shape=jax.ShapeDtypeStruct((N, C, HW), x.dtype),
        grid_spec=pltpu.PrefetchScalarGridSpec(
            num_scalar_prefetch=0,
            grid=(steps,),
            in_specs=[
                pl.BlockSpec((nb, C, HW), lambda n: (n, 0, 0)),
                pl.BlockSpec((C, Cs), lambda n: (0, 0)),
                pl.BlockSpec((1, Cs), lambda n: (0, 0)),
                pl.BlockSpec((Cs, C), lambda n: (0, 0)),
                pl.BlockSpec((1, C), lambda n: (0, 0)),
            ],
            out_specs=pl.BlockSpec((nb, C, HW), lambda n: (n, 0, 0)),
        ),
        compiler_params=pltpu.CompilerParams(
            dimension_semantics=("parallel",),
            vmem_limit_bytes=vmem_limit,
        ),
        # Optional in-place writeback over x when the caller can donate it.
        input_output_aliases=({0: 0} if donate_x else {}),
    )(x3, w1t, b1r, w2t, b2r)

    return out3.reshape(N, C, H, W)


def squeeze_excitation_ref(x, w1, b1, w2, b2):
    """Pure-JAX reference matching the PyTorch module semantics."""
    pooled = jnp.mean(x, axis=(2, 3))                     # (N, C)
    h = pooled @ w1.T + b1                                # (N, Cs)
    h = h * jax.nn.sigmoid(h)                             # Swish
    g = jax.nn.sigmoid(h @ w2.T + b2)                     # (N, C)
    return x * g[:, :, None, None]


if __name__ == "__main__":
    key = jax.random.PRNGKey(0)
    k_x, k_w1, k_b1, k_w2, k_b2 = jax.random.split(key, 5)

    N, C, H, W = 2, 4, 16, 16
    squeeze_factor = 4
    Cs = max(1, C // squeeze_factor)

    x = jax.random.normal(k_x, (N, C, H, W), dtype=jnp.float32)
    # Deterministic synthetic parameters (1x1 Conv2d weights squeezed to 2D).
    w1 = jax.random.normal(k_w1, (Cs, C), dtype=jnp.float32) * 0.1
    b1 = jax.random.normal(k_b1, (Cs,), dtype=jnp.float32) * 0.1
    w2 = jax.random.normal(k_w2, (C, Cs), dtype=jnp.float32) * 0.1
    b2 = jax.random.normal(k_b2, (C,), dtype=jnp.float32) * 0.1

    # 1) Main test (auto tiling).
    out = jax.block_until_ready(squeeze_excitation(x, w1, b1, w2, b2))
    ref = squeeze_excitation_ref(x, w1, b1, w2, b2)
    assert out.shape == x.shape
    assert jnp.allclose(out, ref, atol=1e-5, rtol=1e-5), "mismatch vs reference"

    # 2) Ragged batch tail (N % block_n != 0) — exercises Pallas block padding
    #    semantics that the auto-picked tiling can also produce.
    xr = jax.random.normal(k_x, (5, C, H, W), dtype=jnp.float32)
    outr = jax.block_until_ready(squeeze_excitation(xr, w1, b1, w2, b2, block_n=2))
    refr = squeeze_excitation_ref(xr, w1, b1, w2, b2)
    assert jnp.allclose(outr, refr, atol=1e-5, rtol=1e-5), "ragged-N mismatch"

    # 3) bf16 activations — exercises the bf16-MXU operand path.
    xb = x.astype(jnp.bfloat16)
    outb = jax.block_until_ready(squeeze_excitation(xb, w1, b1, w2, b2))
    refb = squeeze_excitation_ref(xb.astype(jnp.float32), w1, b1, w2, b2)
    assert outb.dtype == jnp.bfloat16
    assert jnp.allclose(outb.astype(jnp.float32), refb, atol=3e-2, rtol=3e-2), \
        "bf16 mismatch"

    print("KERNEL_OK")
</pallas_src>

<mosaic_0001>
module attributes {stable_mosaic.version = 11 : i64} {
  func.func @_se_kernel(%arg0: i32, %arg1: memref<1x4x256xf32, #tpu.memory_space<vmem>>, %arg2: memref<4x1xf32, #tpu.memory_space<vmem>>, %arg3: memref<1x1xf32, #tpu.memory_space<vmem>>, %arg4: memref<1x4xf32, #tpu.memory_space<vmem>>, %arg5: memref<1x4xf32, #tpu.memory_space<vmem>>, %arg6: memref<1x4x256xf32, #tpu.memory_space<vmem>>) attributes {dimension_semantics = [#tpu.dimension_semantics<parallel>], iteration_bounds = array<i64: 2>, scalar_prefetch = 0 : i64, scratch_operands = 0 : i64, tpu.core_type = #tpu.core_type<tc>, window_params = [{transform_indices = @transform_0, window_bounds = array<i64: 1, 4, 256>}, {pipeline_mode = #tpu.pipeline_mode<synchronous>, transform_indices = @transform_1, window_bounds = array<i64: 4, 1>}, {pipeline_mode = #tpu.pipeline_mode<synchronous>, transform_indices = @transform_2, window_bounds = array<i64: 1, 1>}, {pipeline_mode = #tpu.pipeline_mode<synchronous>, transform_indices = @transform_3, window_bounds = array<i64: 1, 4>}, {pipeline_mode = #tpu.pipeline_mode<synchronous>, transform_indices = @transform_4, window_bounds = array<i64: 1, 4>}, {transform_indices = @transform_5, window_bounds = array<i64: 1, 4, 256>}]} {
    %c0 = arith.constant 0 : index
    %c0_0 = arith.constant 0 : index
    %c0_1 = arith.constant 0 : index
    %0 = vector.load %arg1[%c0, %c0_0, %c0_1] : memref<1x4x256xf32, #tpu.memory_space<vmem>>, vector<1x4x256xf32>
    %cst = arith.constant dense<0.000000e+00> : vector<1x4xf32>
    %1 = vector.multi_reduction <add>, %0, %cst [2] : vector<1x4x256xf32> to vector<1x4xf32>
    %cst_2 = arith.constant 2.560000e+02 : f32
    %2 = vector.broadcast %cst_2 : f32 to vector<1x4xf32>
    %3 = arith.divf %1, %2 : vector<1x4xf32>
    %c0_3 = arith.constant 0 : index
    %c0_4 = arith.constant 0 : index
    %4 = vector.load %arg2[%c0_3, %c0_4] : memref<4x1xf32, #tpu.memory_space<vmem>>, vector<4x1xf32>
    %cst_5 = arith.constant dense<0.000000e+00> : vector<1x1xf32>
    %5 = tpu.matmul %3, %4, %cst_5 {dimension_numbers = #tpu.dot_dimension_numbers<[1], [0], [0], [1], [0, 0, 1, 1], [], []>} : vector<1x4xf32>, vector<4x1xf32>, vector<1x1xf32> -> vector<1x1xf32>
    %c0_6 = arith.constant 0 : index
    %c0_7 = arith.constant 0 : index
    %6 = vector.load %arg3[%c0_6, %c0_7] : memref<1x1xf32, #tpu.memory_space<vmem>>, vector<1x1xf32>
    %7 = arith.addf %5, %6 : vector<1x1xf32>
    %8 = arith.negf %7 : vector<1x1xf32>
    %9 = math.exp %8 : vector<1x1xf32>
    %cst_8 = arith.constant 1.000000e+00 : f32
    %10 = vector.broadcast %cst_8 : f32 to vector<1x1xf32>
    %11 = arith.addf %10, %9 : vector<1x1xf32>
    %12 = arith.divf %10, %11 : vector<1x1xf32>
    %13 = arith.mulf %7, %12 : vector<1x1xf32>
    %c0_9 = arith.constant 0 : index
    %c0_10 = arith.constant 0 : index
    %14 = vector.load %arg4[%c0_9, %c0_10] : memref<1x4xf32, #tpu.memory_space<vmem>>, vector<1x4xf32>
    %cst_11 = arith.constant dense<0.000000e+00> : vector<1x4xf32>
    %15 = tpu.matmul %13, %14, %cst_11 {dimension_numbers = #tpu.dot_dimension_numbers<[1], [0], [0], [1], [0, 0, 1, 1], [], []>} : vector<1x1xf32>, vector<1x4xf32>, vector<1x4xf32> -> vector<1x4xf32>
    %c0_12 = arith.constant 0 : index
    %c0_13 = arith.constant 0 : index
    %16 = vector.load %arg5[%c0_12, %c0_13] : memref<1x4xf32, #tpu.memory_space<vmem>>, vector<1x4xf32>
    %17 = arith.addf %15, %16 : vector<1x4xf32>
    %18 = arith.negf %17 : vector<1x4xf32>
    %19 = math.exp %18 : vector<1x4xf32>
    %cst_14 = arith.constant 1.000000e+00 : f32
    %20 = vector.broadcast %cst_14 : f32 to vector<1x4xf32>
    %21 = arith.addf %20, %19 : vector<1x4xf32>
    %22 = arith.divf %20, %21 : vector<1x4xf32>
    %c0_15 = arith.constant 0 : index
    %c0_16 = arith.constant 0 : index
    %c0_17 = arith.constant 0 : index
    %23 = vector.load %arg1[%c0_15, %c0_16, %c0_17] : memref<1x4x256xf32, #tpu.memory_space<vmem>>, vector<1x4x256xf32>
    %24 = vector.shape_cast %22 : vector<1x4xf32> to vector<1x4x1xf32>
    %25 = vector.broadcast %24 : vector<1x4x1xf32> to vector<1x4x256xf32>
    %26 = arith.mulf %23, %25 : vector<1x4x256xf32>
    %c0_18 = arith.constant 0 : index
    %c0_19 = arith.constant 0 : index
    %c0_20 = arith.constant 0 : index
    %27 = vector.load %arg6[%c0_18, %c0_19, %c0_20] : memref<1x4x256xf32, #tpu.memory_space<vmem>>, vector<1x4x256xf32>
    tpu.vector_store %arg6[%c0_18, %c0_19, %c0_20], %26 {strides = array<i32>} : memref<1x4x256xf32, #tpu.memory_space<vmem>>, vector<1x4x256xf32>,
    return
  }
  func.func @transform_0(%arg0: i32) -> (i32, i32, i32) {
    %c0_i32 = arith.constant 0 : i32
    %c0_i32_0 = arith.constant 0 : i32
    %c0_i32_1 = arith.constant 0 : i32
    return %arg0, %c0_i32, %c0_i32_0 : i32, i32, i32
  }
  func.func @transform_1(%arg0: i32) -> (i32, i32) {
    %c0_i32 = arith.constant 0 : i32
    %c0_i32_0 = arith.constant 0 : i32
    %c0_i32_1 = arith.constant 0 : i32
    return %c0_i32, %c0_i32_0 : i32, i32
  }
  func.func @transform_2(%arg0: i32) -> (i32, i32) {
    %c0_i32 = arith.constant 0 : i32
    %c0_i32_0 = arith.constant 0 : i32
    %c0_i32_1 = arith.constant 0 : i32
    return %c0_i32, %c0_i32_0 : i32, i32
  }
  func.func @transform_3(%arg0: i32) -> (i32, i32) {
    %c0_i32 = arith.constant 0 : i32
    %c0_i32_0 = arith.constant 0 : i32
    %c0_i32_1 = arith.constant 0 : i32
    return %c0_i32, %c0_i32_0 : i32, i32
  }
  func.func @transform_4(%arg0: i32) -> (i32, i32) {
    %c0_i32 = arith.constant 0 : i32
    %c0_i32_0 = arith.constant 0 : i32
    %c0_i32_1 = arith.constant 0 : i32
    return %c0_i32, %c0_i32_0 : i32, i32
  }
  func.func @transform_5(%arg0: i32) -> (i32, i32, i32) {
    %c0_i32 = arith.constant 0 : i32
    %c0_i32_0 = arith.constant 0 : i32
    %c0_i32_1 = arith.constant 0 : i32
    return %arg0, %c0_i32, %c0_i32_0 : i32, i32, i32
  }
}

</mosaic_0001>

<bundles_post_ra>
// kernel: tpu_custom_call.1
= control target key start
LH: loop header
LB: loop body
LE: loop exit
PB: predicated region body
PF: predicated region fallthrough
CT: control target
= control target key end

     0   :  { %s940_s0 = inlined_call_operand.hbm [shape: f32[2,4,256], index: 0, kind: input, shape index: {}]   ;;  %s941_s1 = inlined_call_operand.vmem [shape: f32[4,1], index: 1, kind: input, shape index: {}]   ;;  %s942_s2 = inlined_call_operand.<no memory space> [shape: f32[1,1], index: 2, kind: input, shape index: {}]   ;;  %s943_s3 = inlined_call_operand.vmem [shape: f32[1,4], index: 3, kind: input, shape index: {}]   ;;  %s944_s4 = inlined_call_operand.vmem [shape: f32[1,4], index: 4, kind: input, shape index: {}]   ;;  %s945_s5 = inlined_call_operand.hbm [shape: f32[2,4,256], index: 5, kind: output, shape index: {}]  }
   0x1   :  { %v10_v0 = vstv %s942_s2 }
   0x2   :  { %11 = vst [vmem:[#allocation2] sm:$0x1] %v10_v0 }
   0x3   :  { %12 = vsyncpa [#allocation4], 0 }
   0x4   :  { %14 = vsyncpa [#allocation4 + $0x1], 0 }
   0x5   :  { %15 = vsyncpa [#allocation5], 0 }
   0x6   :  { %17 = vsyncpa [#allocation5 + $0x1], 0  ;;  %s766_s20 = smov 0   ;;  %s768_s21 = smov 0  }
   0x7   :  { %s770_s22 = smov 0   ;;  %s772_s23 = smov 0  }
   0x8 LB: > { %s787_s2 = sadd.s32 4294967295, %s726_s23   ;;  %s536_s24 = sadd.s32 4294967294, %s726_s23   ;;  %s726_s23 = sphi %s772_s23, %s960_s23   ;;  %s722_s22 = sphi %s770_s22, %s959_s22   ;;  %s718_s21 = sphi %s768_s21, %s958_s21   ;;  %s714_s20 = sphi %s766_s20, %s957_s20  }
   0x9   : > { %s791_s25 = sadd.s32 1, %s726_s23   ;;  %s30_s26 = sadd.s32 1, %s722_s22 }
   0xa   : > { %s27_s27 = ssub.s32 %s726_s23, %s791_s25  ;;  %p37_p0 = scmp.ne.s32.totalorder %s722_s22, %s718_s21 }
   0xb   : > { %p28_p1 = scmp.eq.s32.totalorder %s27_s27, 0  ;;  %p38_p2 = scmp.eq.s32.totalorder %s726_s23, 0 }
   0xc   : > { %p43_p3 = scmp.ne.s32.totalorder %s718_s21, %s714_s20  ;;  %p44_p4 = scmp.eq.s32.totalorder %s787_s2, 0 }
   0xd   : > { %s803_s28 = scalar_select %p28_p1, %s722_s22, %s30_s26  }
   0xe   : > { %p805_p5 = por %p38_p2, %p37_p0  ;;  %p809_p6 = por %p44_p4, %p43_p3 }
   0xf   : > { %p151_p7 = scmp.eq.s32.totalorder %s787_s2, 1  ;;  %p157_p8 = scmp.eq.s32.totalorder %s536_s24, 1 }
  0x10   : > { %p584_p10 = scmp.lt.s32.totalorder %s726_s23, 2  ;;  %s189_s8 = sand.u32 1, %s722_s22  }
  0x11   : > { %p816_p11 = por %p151_p7, %p37_p0  ;;  %p820_p12 = por %p157_p8, %p43_p3 }
  0x12   : > { %s556_s9 = sshll.u32 %s726_s23, 7  ;;  %s539_s10 = sshll.u32 %s189_s8, 3 }
  0x13   : > { %s949_s6 = scalar_select %p816_p11, 1, 0 }
  0x14   : > { %s950_s7 = scalar_select %p820_p12, 1, 0 }
  0x15   : > { %s829_s13 = scalar_lea.hbm %s940_s0, %s556_s9  ;;  %s193_s14 = scalar_lea.vmem [#allocation3], %s539_s10 }
  0x16   : > { %s201_s15 = sshll.u32 %s193_s14, 4  ;;  %p833_p13 = pnand %p584_p10, %p805_p5  ;;  %s837_s15 = int_to_ptr.vmem [resolvable:$true] %s201_s15 }
  0x17   : > { %s190_s17 = scalar_lea.sflag [#allocation4], %s189_s8  ;;  %s630_s18 = scalar_lea.hbm %s829_s13, 128 }
  0x18   : > { %p631_p2 = scmp.ne.s32.totalorder %s829_s13, %s630_s18  ;;  %p632_p3 = pneg %p833_p13 }
  0x19   : > { %s635_s26 = scalar_lea.hbm %s940_s0, 256  ;;  %p636_p5 = scmp.lt.u32.totalorder %s829_s13, %s940_s0 }
  0x1a   : > { %p633_p4 = pnand %p632_p3, %p631_p2  ;;  %p637_p8 = scmp.lt.u32.totalorder %s635_s26, %s630_s18 }
  0x1b   : > { %p639_p9 = scmp.lt.u32.totalorder %s630_s18, %s829_s13 }
  0x1c   : > { %p634_p7 = pneg %p633_p4  ;;  %p638_p10 = por %p637_p8, %p636_p5 }
  0x1e   : > { %p640_p0 = por %p639_p9, %p638_p10 }
  0x20   : > { %p641_p1 = pnand %p640_p0, %p634_p7 }
  0x22   : > { %644 = shalt.err (!%p641_p1)
}
  0x23   : > { %s645_s8 = scalar_lea.vmem %s837_s15, 128  ;;  %s728_s9 = smov [#allocation3]  }
  0x24   : > { %p646_p2 = scmp.ne.s32.totalorder %s837_s15, %s645_s8  ;;  %s650_s10 = sshll.u32 %s728_s9, 4  ;;  %s651_s10 = int_to_ptr.vmem [resolvable:$false] %s650_s10 }
  0x25   : > { %s652_s11 = scalar_lea.vmem %s651_s10, 256  ;;  %p653_p11 = scmp.lt.s32.totalorder %s837_s15, %s651_s10 }
  0x26   : > { %p648_p4 = pnand %p646_p2, %p632_p3  ;;  %p654_p5 = scmp.lt.s32.totalorder %s652_s11, %s645_s8 }
  0x28   : > { %p649_p12 = pneg %p648_p4  ;;  %p655_p8 = por %p654_p5, %p653_p11 }
  0x2a   : > { %p656_p9 = pnand %p655_p8, %p649_p12 }
  0x2c   : > { %659 = shalt.err (!%p656_p9)
}
  0x2d   : > { %579 = dma.hbm_to_vmem [thread:$0]  (!%p833_p13), %s829_s13, 128, %s837_s15, %s190_s17  }
  0x2e   : > { %p952_p0 = scmp.lt.s32.totalorder %s726_s23, 3  ;;  %p953_p1 = scmp.ge.s32.totalorder %s726_s23, 1 }
  0x30   : > { %p207_p3 = pnand %p953_p1, %p952_p0 }
  0x31   : > { %s871_s12 = sand.u32 (!%p207_p3), 1, %s718_s21  }
  0x32   : > { %210 = sbr.rel (%p207_p3) target bundleno = 827 (0x33b), region = 40  ;;  %s543_s14 = sshll.u32 (!%p207_p3), %s871_s12, 3 }
  0x33   : > { %s213_s18 = scalar_lea.sflag (!%p207_p3), [#allocation4], %s871_s12  ;;  %s216_s16 = scalar_lea.vmem (!%p207_p3), [#allocation3], %s543_s14 }
  0x39   : > { %705 = dma.done.wait (%p809_p6), %s213_s18, 128  }
  0x3a   : > { %707 = vsyncadd (%p809_p6), %s213_s18, 4294967168  ;;  %vm247_vm0 = vcmask 1043456   ;;  %v243_v1 = vld [vmem:[%s216_s16] sm:$0xff]  ;;  %v729_v6 = vmov 0.0   ;;  %vm730_vm1 = vmmov 0   ;;  %v258_v8 = vlaneseq  ;;  %s557_s26 = sshll.u32 %s787_s2, 7 }
  0x3b   : > { %v245_v2 = vcombine.high %v243_v1, %v243_v1  ;;  %v248_v3 = vsel %vm247_vm0, %v243_v1, 0.0  ;;  %562 = vmatprep.subr.mxu0 %v729_v6  ;;  %v255_v7 = vld [vmem:[%s941_s1] sm:$0xf]  ;;  %567 = vmatprep.subr.mxu1 %v729_v6  ;;  %vm264_vm2 = vcmask 31744   ;;  %vm353_vm3 = vcmask 1040384   ;;  %s242_s27 = scalar_lea.vmem [#allocation6], %s543_s14  ;;  %s896_s10 = scalar_lea.hbm %s945_s5, %s557_s26 }
  0x3c   : > { %563 = vmatpush3.msk.msra.mxu0 %vm247_vm0, %v255_v7  ;;  %564 = vmatprep.mubr.msk.f32.mxu0 %vm730_vm1, %v729_v6  ;;  %v259_v9 = vand.u32 127, %v258_v8  ;;  %v261_v10 = vshrl.u32 %v258_v8, 7  ;;  %v347_v15 = vld [vmem:[%s943_s3] sm:$0x1]  ;;  %vm349_vm4 = vcmask 7168   ;;  %s466_s29 = sshll.u32 %s242_s27, 4  ;;  %s898_s29 = int_to_ptr.vmem [resolvable:$true] %s466_s29 }
  0x3d   : > { %v249_v4 = vsel %vm247_vm0, %v245_v2, 0.0  ;;  %569 = vmatprep.mubr.msk.f32.mxu1 %vm730_vm1, %v729_v6  ;;  %568 = vmatpush3.msk.msra.mxu1 %vm353_vm3, %v347_v15  ;;  %v256_v16 = vld [vmem:[#allocation2] sm:$0x1]  ;;  %v731_v35 = vmov 839922192   ;;  %s452_s11 = scalar_lea.sflag [#allocation5], %s871_s12 }
  0x3e   : > { %v250_v5 = vadd.f32 %v249_v4, %v248_v3  ;;  %v262_v11 = vsub.s32 %v259_v9, %v261_v10  ;;  %v348_v25 = vld [vmem:[%s944_s4] sm:$0x1]  ;;  %v435_v32 = vsub.s32 0, %v261_v10  ;;  %v442_v36 = vunpack.c.l.s4 %v731_v35  ;;  %s660_s18 = scalar_lea.vmem %s898_s29, 128  ;;  %p954_p11 = scmp.ne.s32.totalorder %s949_s6, 0 }
  0x3f   : > { %p661_p6 = scmp.ne.s32.totalorder %s898_s29, %s660_s18  ;;  %s732_s2 = smov [#allocation6]  }
  0x40   : > { %251 = vadd.xlane.f32.xlu0 %v250_v5  ;;  %v443_v37 = vunpack.c.0.s8 %v442_v36  ;;  %s664_s14 = sshll.u32 %s732_s2, 4  ;;  %s665_s14 = int_to_ptr.vmem [resolvable:$false] %s664_s14 }
  0x41   : > { %p662_p12 = pnand %p661_p6, %p954_p11  ;;  %s666_s16 = scalar_lea.vmem %s665_s14, 256 }
  0x42   : > { %v446_v38 = vsub.s32 %v443_v37, %v261_v10  ;;  %p667_p7 = scmp.lt.s32.totalorder %s898_s29, %s665_s14  ;;  %p668_p10 = scmp.lt.s32.totalorder %s666_s16, %s660_s18 }
  0x43   : > { %p663_p13 = pneg %p662_p12 }
  0x44   : > { %p669_p2 = por %p668_p10, %p667_p7 }
  0x46   : > { %p670_p4 = pnand %p669_p2, %p663_p13 }
  0xcd   : > { %v252_v12 = vpop.xlane.xlu0 %251 }
  0xce   : > { %v254_v13 = vmul.f32 0.00390625, %v252_v12 }
  0xd0   : > { %v263_v14 = vrot.slane %v254_v13, %v262_v11 }
  0xd2   : > { %565 = vmatmul.mubr.msk.f32.vlgmr.msra.gmra.mrb[0].mxu0 %vm264_vm2, %v263_v14 }
 0x1a5   : > { %v336_v17 = vpop.f32.mrb[0].mxu0 }
 0x1a6   : > { %v337_v18 = vadd.f32 %v336_v17, %v256_v16  ;;  %v566_v19 = vpop.f32.mrb[1].mxu0 }
 0x1a8   : > { %v547_v20 = vmul.f32 -1.442695, %v337_v18 }
 0x1aa   : > { %622 = vpow2.f32 %v547_v20 }
 0x1b4   : > { %v623_v21 = vpop.eup %622 }
 0x1b5   : > { %v343_v22 = vadd.f32 1.0, %v623_v21 }
 0x1b7   : > { %624 = vrcp.f32 %v343_v22 }
 0x1c1   : > { %v625_v23 = vpop.eup %624 }
 0x1c2   : > { %v346_v24 = vmul.f32 %v625_v23, %v337_v18 }
 0x1c4   : > { %570 = vmatmul.mubr.msk.f32.vlgmr.msra.gmra.mrb[0].mxu1 %vm349_vm4, %v346_v24 }
 0x297   : > { %v423_v26 = vpop.f32.mrb[0].mxu1 }
 0x298   : > { %v424_v27 = vadd.f32 %v423_v26, %v348_v25  ;;  %v571_v28 = vpop.f32.mrb[1].mxu1 }
 0x29a   : > { %v550_v29 = vmul.f32 -1.442695, %v424_v27 }
 0x29c   : > { %626 = vpow2.f32 %v550_v29 }
 0x2a6   : > { %v627_v30 = vpop.eup %626 }
 0x2a7   : > { %v430_v31 = vadd.f32 1.0, %v627_v30 }
 0x2a9   : > { %628 = vrcp.f32 %v430_v31 }
 0x2b3   : > { %v629_v33 = vpop.eup %628 }
 0x2b4   : > { %v436_v34 = vrot.slane %v629_v33, %v435_v32 }
 0x2b6   : > { %438 = vbcast.lane.b32.xlu0 %v436_v34, 256 }
 0x328   : > { %v439_v39 = vpop.permute.xlu0 %438 }
 0x329   : > { %v447_v40 = vrot.slane %v439_v39, %v446_v38 }
 0x32b   : > { %v449_v41 = vmul.f32 %v447_v40, %v243_v1 }
 0x32d   : > { %450 = vst [vmem:[%s242_s27] sm:$0xff] %v449_v41 }
 0x32e   : > { %673 = shalt.err (!%p670_p4)
}
 0x32f   : > { %s674_s12 = scalar_lea.hbm %s896_s10, 128  ;;  %s678_s30 = scalar_lea.hbm %s945_s5, 256 }
 0x330   : > { %p675_p5 = scmp.ne.s32.totalorder %s896_s10, %s674_s12  ;;  %p679_p0 = scmp.lt.u32.totalorder %s896_s10, %s945_s5 }
 0x331   : > { %p680_p1 = scmp.lt.u32.totalorder %s678_s30, %s674_s12  ;;  %p682_p6 = scmp.lt.u32.totalorder %s674_s12, %s896_s10 }
 0x332   : > { %p676_p8 = pnand %p675_p5, %p954_p11 }
 0x333   : > { %p681_p3 = por %p680_p1, %p679_p0 }
 0x334   : > { %p677_p9 = pneg %p676_p8 }
 0x335   : > { %p683_p12 = por %p682_p6, %p681_p3 }
 0x337   : > { %p684_p13 = pnand %p683_p12, %p677_p9 }
 0x339   : > { %687 = shalt.err (!%p684_p13)
}
 0x33a   : > { %574 = dma.vmem_to_hbm [thread:$0]  (%p954_p11), %s898_s29, 128, %s896_s10, %s452_s11  }
 0x33b PF: > { %s478_s24 = sand.u32 1, %s714_s20   ;;  %p955_p7 = scmp.ne.s32.totalorder %s950_s7, 0 }
 0x33c   : > { %p956_p10 = scmp.ge.s32.totalorder %s726_s23, 2  ;;  %s479_s26 = scalar_lea.sflag [#allocation5], %s478_s24 }
 0x33e   : > { %p581_p2 = pnand %p956_p10, %p955_p7 }
 0x340   : > { %709 = dma.done.wait (!%p581_p2), %s479_s26, 128  }
 0x341   : > { %711 = vsyncadd (!%p581_p2), %s479_s26, 4294967168  ;;  %p20_p4 = scmp.ge.s32.totalorder %s791_s25, 4   ;;  %s957_s20 = smov %s718_s21 }
 0x342   : > { %s958_s21 = smov %s722_s22  ;;  %s959_s22 = smov %s803_s28 }
 0x343   : > { %s960_s23 = smov %s791_s25  ;;  %22 = sbr.rel (!%p20_p4) target bundleno = 8 (0x8), region = 85 }
 0x34a   :  { %484 = vsyncpa [#allocation4], 1 }
 0x34b   :  { %486 = vsyncpa [#allocation4 + $0x1], 1 }
 0x34c   :  { %487 = vsyncpa [#allocation5], 1 }
 0x34d   :  { %489 = vsyncpa [#allocation5 + $0x1], 1 }

</bundles_post_ra>
